<compile_context>
chip_gen: v6e
topology: v6e:2x2x1
jax: 0.10.0
libtpu: 0.0.40
codegen_flags: <defaults>
</compile_context>

<pallas_src>
import functools

import jax
import jax.numpy as jnp
import numpy as np
from jax import lax
from jax.experimental import pallas as pl
from jax.experimental.pallas import tpu as pltpu

UPPER_BOUND = 1.0
IGNORE_INDEX = 255
# TODO(synk): cfg.BATCH_WEIGHTING is external config; fixed to False here
#             (per-image weights), norm=False (the "1 - hist" branch).


def _round_up(x, m):
    return ((x + m - 1) // m) * m


def _cdiv(a, b):
    return (a + b - 1) // b


def _default_tiling():
    """Generation-aware (lane_tile, vmem_limit_bytes).

    128-MiB-VMEM parts (v5e/v6e): 64K-lane tiles, ~100 MiB scoped VMEM.
    64-MiB parts (v7x) / unknown: 32K-lane tiles, 44 MiB scoped VMEM.
    """
    vmem_bytes = 64 * 1024 * 1024
    try:
        vmem_bytes = int(pltpu.get_tpu_info().vmem_capacity_bytes)
    except Exception:
        pass
    if vmem_bytes >= 100 * 1024 * 1024:
        return 64 * 1024, 100 * 1024 * 1024
    return 32 * 1024, 44 * 1024 * 1024


def _partials_kernel(logits_ref, tgt_ref, cnt_ref, s_ref, *,
                     hw, hw_tile, n_hw, mask_tail):
    """Accumulate per-class pixel counts and per-class sums of log_softmax."""
    p = pl.program_id(1)          # spatial chunk (parallel)
    t = pl.program_id(2)          # tile within chunk (reduction, innermost)

    @pl.when(t == 0)
    def _init():
        cnt_ref[...] = jnp.zeros_like(cnt_ref)
        s_ref[...] = jnp.zeros_like(s_ref)

    logits = logits_ref[0].astype(jnp.float32)          # (C, T)
    tgt = tgt_ref[0].astype(jnp.int32)                  # (1, T)
    C, T = logits.shape

    if mask_tail:
        # Tail / duplicated tiles: lanes >= rem hold junk (clipped boundary
        # DMA or a re-read of the last in-range tile).  Force their target to
        # an impossible class; select-based masking (not multiply) so NaN/Inf
        # in junk lanes cannot propagate into the sums.
        rem = hw - (p * n_hw + t) * hw_tile              # scalar, may be <= 0
        lane = lax.broadcasted_iota(jnp.int32, (1, T), 1)
        tgt = jnp.where(lane < rem, tgt, jnp.int32(-1))

    # log_softmax over the class (sublane) axis.
    m = jnp.max(logits, axis=0, keepdims=True)           # (1, T)
    z = logits - m
    lse = jnp.log(jnp.sum(jnp.exp(z), axis=0, keepdims=True))
    logp = z - lse                                       # (C, T)

    # (C,1) class iota vs (1,T) target: the == broadcasts, no (C,T) int iota
    # plane and no f32 one-hot are materialized.  ignore_index / out-of-range
    # targets match nothing.
    cls = lax.broadcasted_iota(jnp.int32, (C, 1), 0)
    eq = cls == tgt                                      # (C, T) bool

    cnt = jnp.sum(jnp.where(eq, 1.0, 0.0), axis=1, keepdims=True)   # (C, 1)
    s = jnp.sum(jnp.where(eq, logp, 0.0), axis=1, keepdims=True)    # (C, 1)

    cnt_ref[...] += cnt.reshape(1, 1, C, 1)
    s_ref[...] += s.reshape(1, 1, C, 1)


@functools.partial(jax.jit, static_argnames=("hw_tile", "n_par", "vmem_limit"))
def _loss_impl(inputs, targets, *, hw_tile, n_par, vmem_limit):
    B, C, H, W = inputs.shape
    HW = H * W

    logits = inputs.reshape(B, C, HW)            # dtype preserved (bf16 ok)
    tgt = targets.reshape(B, 1, HW)
    if not jnp.issubdtype(tgt.dtype, jnp.integer):
        tgt = tgt.astype(jnp.int32)              # only copies if non-integer

    num_tiles = _cdiv(HW, hw_tile)
    n_hw = _cdiv(num_tiles, n_par)
    mask_tail = (HW % hw_tile != 0) or (n_par * n_hw != num_tiles)

    if n_par * n_hw == num_tiles:
        def tile_of(p_, t_):
            return p_ * n_hw + t_
    else:
        last = num_tiles - 1

        def tile_of(p_, t_):
            # Keep block indices in range; the duplicated tile is fully
            # lane-masked in the kernel (rem <= 0) so it contributes zero.
            return jnp.minimum(p_ * n_hw + t_, last)

    kernel = functools.partial(_partials_kernel, hw=HW, hw_tile=hw_tile,
                               n_hw=n_hw, mask_tail=mask_tail)

    cnt_part, s_part = pl.pallas_call(
        kernel,
        out_shape=(jax.ShapeDtypeStruct((B, n_par, C, 1), jnp.float32),
                   jax.ShapeDtypeStruct((B, n_par, C, 1), jnp.float32)),
        grid_spec=pltpu.PrefetchScalarGridSpec(
            num_scalar_prefetch=0,
            grid=(B, n_par, n_hw),               # reduction axis last
            in_specs=[
                pl.BlockSpec((1, C, hw_tile), lambda b, p, t: (b, 0, tile_of(p, t))),
                pl.BlockSpec((1, 1, hw_tile), lambda b, p, t: (b, 0, tile_of(p, t))),
            ],
            out_specs=[
                pl.BlockSpec((1, 1, C, 1), lambda b, p, t: (b, p, 0, 0)),
                pl.BlockSpec((1, 1, C, 1), lambda b, p, t: (b, p, 0, 0)),
            ],
        ),
        compiler_params=pltpu.CompilerParams(
            dimension_semantics=("parallel", "parallel", "arbitrary"),
            vmem_limit_bytes=vmem_limit,
        ),
    )(logits, tgt)

    # Tiny per-image epilogue (C ~ 19): per-image weights from the histogram
    # and the weighted-mean NLL.  Doing this in XLA keeps both grid axes
    # (B, hw_chunk) purely parallel in the kernel.
    cnt = jnp.sum(cnt_part[:, :, :, 0], axis=1)          # (B, C)
    S = jnp.sum(s_part[:, :, :, 0], axis=1)              # (B, C)
    total = jnp.sum(cnt, axis=1, keepdims=True)          # (B, 1) valid pixels
    hist = cnt / jnp.where(total > 0.0, total, 1.0)
    weights = jnp.where(cnt > 0.0, UPPER_BOUND * (1.0 - hist), 0.0) + 1.0
    num = jnp.sum(weights * S, axis=1)                   # (B,)
    den = jnp.sum(weights * cnt, axis=1)                 # (B,)
    # Image with zero valid pixels contributes 0 instead of NaN.
    loss_i = jnp.where(den > 0.0, -num / jnp.where(den > 0.0, den, 1.0), 0.0)
    return jnp.sum(loss_i)


def image_based_cross_entropy_loss_2d(inputs, targets, num_classes,
                                      lane_tile=None, hw_split=None):
    """inputs: (B, C, H, W) float (NCHW); targets: (B, H, W) int, 255 = ignore."""
    B, C, H, W = inputs.shape
    assert C == num_classes
    HW = H * W

    auto_tile, vmem_limit = _default_tiling()
    lane_tile = auto_tile if lane_tile is None else _round_up(int(lane_tile), 128)

    if _round_up(HW, 128) <= lane_tile:
        hw_tile = HW              # one exact block (block dim == full array dim)
    else:
        hw_tile = lane_tile       # multiple of 128; tail tile lane-masked
    num_tiles = _cdiv(HW, hw_tile)

    if hw_split is None:
        # Odd batch (esp. B == 1): split the spatial axis so both TensorCores
        # on dual-core parts (v7x) get work; harmless on single-TC chips.
        hw_split = 2 if (B % 2 == 1 and num_tiles >= 2) else 1
    n_par = max(1, min(int(hw_split), num_tiles))

    return _loss_impl(inputs, targets, hw_tile=hw_tile, n_par=n_par,
                      vmem_limit=vmem_limit)


def _reference_loss(inputs, targets, num_classes):
    """Pure-JAX reference mirroring the PyTorch forward (per-image weights)."""
    B = inputs.shape[0]
    total = jnp.float32(0.0)
    for i in range(B):
        x = inputs[i].astype(jnp.float32)               # (C, H, W)
        t = targets[i]                                  # (H, W)
        logp = jax.nn.log_softmax(x, axis=0)
        counts = jnp.stack(
            [jnp.sum((t == c).astype(jnp.float32)) for c in range(num_classes)])
        hist = counts / jnp.sum(counts)
        w = (hist != 0).astype(jnp.float32) * UPPER_BOUND * (1.0 - hist) + 1.0
        valid = (t >= 0) & (t < num_classes)
        tc = jnp.clip(t, 0, num_classes - 1)
        pick = jnp.take_along_axis(logp, tc[None], axis=0)[0]
        wpix = w[tc] * valid.astype(jnp.float32)
        total = total + (-jnp.sum(wpix * pick) / jnp.sum(wpix))
    return total


if __name__ == "__main__":
    key = jax.random.PRNGKey(0)
    k1, k2, k3 = jax.random.split(key, 3)

    B, C, H, W = 2, 4, 16, 16
    x = jax.random.normal(k1, (B, C, H, W), dtype=jnp.float32)
    t = jax.random.randint(k2, (B, H, W), 0, C, dtype=jnp.int32)
    ignore_mask = jax.random.uniform(k3, (B, H, W)) < 0.1
    t = jnp.where(ignore_mask, jnp.int32(IGNORE_INDEX), t)

    ref = np.asarray(jax.block_until_ready(_reference_loss(x, t, C)))

    # 1) Default config: the whole 256-pixel image is a single exact tile.
    loss = jax.block_until_ready(image_based_cross_entropy_loss_2d(x, t, C))
    np.testing.assert_allclose(np.asarray(loss), ref, rtol=1e-5, atol=1e-5)

    # 2) Multi-tile reduction: force 128-lane tiles so partials accumulate
    #    across the innermost grid axis.
    loss = jax.block_until_ready(
        image_based_cross_entropy_loss_2d(x, t, C, lane_tile=128))
    np.testing.assert_allclose(np.asarray(loss), ref, rtol=1e-5, atol=1e-5)

    # 3) bf16 logits end-to-end (kernel upcasts per tile in VMEM).
    xb = x.astype(jnp.bfloat16)
    refb = np.asarray(jax.block_until_ready(_reference_loss(xb, t, C)))
    lossb = jax.block_until_ready(image_based_cross_entropy_loss_2d(xb, t, C))
    np.testing.assert_allclose(np.asarray(lossb), refb, rtol=1e-4, atol=1e-4)

    # 4) HW not a multiple of 128: no jnp.pad copy, tail lanes are masked.
    H2, W2 = 16, 10
    x2 = jax.random.normal(k1, (B, C, H2, W2), dtype=jnp.float32)
    t2 = jax.random.randint(k2, (B, H2, W2), 0, C, dtype=jnp.int32)
    ref2 = np.asarray(jax.block_until_ready(_reference_loss(x2, t2, C)))
    loss2 = jax.block_until_ready(image_based_cross_entropy_loss_2d(x2, t2, C))
    np.testing.assert_allclose(np.asarray(loss2), ref2, rtol=1e-5, atol=1e-5)
    loss2t = jax.block_until_ready(
        image_based_cross_entropy_loss_2d(x2, t2, C, lane_tile=128))
    np.testing.assert_allclose(np.asarray(loss2t), ref2, rtol=1e-5, atol=1e-5)

    # 5) B == 1: spatial axis split into two parallel chunks (dual-TC path),
    #    with a tile count that does not divide evenly (clamped, fully-masked
    #    duplicate tile must contribute zero).
    x3 = jax.random.normal(k1, (1, C, 16, 24), dtype=jnp.float32)
    t3 = jax.random.randint(k2, (1, 16, 24), 0, C, dtype=jnp.int32)
    ref3 = np.asarray(jax.block_until_ready(_reference_loss(x3, t3, C)))
    loss3 = jax.block_until_ready(
        image_based_cross_entropy_loss_2d(x3, t3, C, lane_tile=128))
    np.testing.assert_allclose(np.asarray(loss3), ref3, rtol=1e-5, atol=1e-5)

    print("KERNEL_OK")
</pallas_src>

<mosaic_0001>
module attributes {stable_mosaic.version = 11 : i64} {
  func.func @_partials_kernel(%arg0: i32, %arg1: i32, %arg2: i32, %arg3: memref<1x4x256xf32, #tpu.memory_space<vmem>>, %arg4: memref<1x1x256xi32, #tpu.memory_space<vmem>>, %arg5: memref<1x1x4x1xf32, #tpu.memory_space<vmem>>, %arg6: memref<1x1x4x1xf32, #tpu.memory_space<vmem>>) attributes {dimension_semantics = [#tpu.dimension_semantics<parallel>, #tpu.dimension_semantics<parallel>, #tpu.dimension_semantics<arbitrary>], iteration_bounds = array<i64: 2, 1, 1>, scalar_prefetch = 0 : i64, scratch_operands = 0 : i64, tpu.core_type = #tpu.core_type<tc>, window_params = [{transform_indices = @transform_0, window_bounds = array<i64: 1, 4, 256>}, {transform_indices = @transform_1, window_bounds = array<i64: 1, 1, 256>}, {transform_indices = @transform_2, window_bounds = array<i64: 1, 1, 4, 1>}, {transform_indices = @transform_3, window_bounds = array<i64: 1, 1, 4, 1>}]} {
    %c0_i32 = arith.constant 0 : i32
    %0 = arith.cmpi eq, %arg2, %c0_i32 : i32
    %1 = arith.extui %0 : i1 to i32
    %c0_i32_0 = arith.constant 0 : i32
    %2 = arith.cmpi ne, %1, %c0_i32_0 : i32
    scf.if %2 {
      %cst_28 = arith.constant 0.000000e+00 : f32
      %38 = vector.broadcast %cst_28 : f32 to vector<1x1x4x1xf32>
      %c0_29 = arith.constant 0 : index
      %c0_30 = arith.constant 0 : index
      %c0_31 = arith.constant 0 : index
      %c0_32 = arith.constant 0 : index
      %39 = vector.load %arg5[%c0_29, %c0_30, %c0_31, %c0_32] : memref<1x1x4x1xf32, #tpu.memory_space<vmem>>, vector<1x1x4x1xf32>
      tpu.vector_store %arg5[%c0_29, %c0_30, %c0_31, %c0_32], %38 {strides = array<i32>} : memref<1x1x4x1xf32, #tpu.memory_space<vmem>>, vector<1x1x4x1xf32>,
      %cst_33 = arith.constant 0.000000e+00 : f32
      %40 = vector.broadcast %cst_33 : f32 to vector<1x1x4x1xf32>
      %c0_34 = arith.constant 0 : index
      %c0_35 = arith.constant 0 : index
      %c0_36 = arith.constant 0 : index
      %c0_37 = arith.constant 0 : index
      %41 = vector.load %arg6[%c0_34, %c0_35, %c0_36, %c0_37] : memref<1x1x4x1xf32, #tpu.memory_space<vmem>>, vector<1x1x4x1xf32>
      tpu.vector_store %arg6[%c0_34, %c0_35, %c0_36, %c0_37], %40 {strides = array<i32>} : memref<1x1x4x1xf32, #tpu.memory_space<vmem>>, vector<1x1x4x1xf32>,
    } else {
    }
    %c0 = arith.constant 0 : index
    %c0_1 = arith.constant 0 : index
    %c0_2 = arith.constant 0 : index
    %3 = vector.load %arg3[%c0, %c0_1, %c0_2] : memref<1x4x256xf32, #tpu.memory_space<vmem>>, vector<1x4x256xf32>
    %4 = vector.shape_cast %3 : vector<1x4x256xf32> to vector<4x256xf32>
    %c0_3 = arith.constant 0 : index
    %c0_4 = arith.constant 0 : index
    %c0_5 = arith.constant 0 : index
    %5 = vector.load %arg4[%c0_3, %c0_4, %c0_5] : memref<1x1x256xi32, #tpu.memory_space<vmem>>, vector<1x1x256xi32>
    %6 = vector.shape_cast %5 : vector<1x1x256xi32> to vector<1x256xi32>
    %cst = arith.constant dense<0xFF800000> : vector<256xf32>
    %7 = vector.multi_reduction <maximumf>, %4, %cst [0] : vector<4x256xf32> to vector<256xf32>
    %8 = vector.shape_cast %7 : vector<256xf32> to vector<1x256xf32>
    %9 = vector.broadcast %8 : vector<1x256xf32> to vector<4x256xf32>
    %10 = arith.subf %4, %9 : vector<4x256xf32>
    %11 = math.exp %10 : vector<4x256xf32>
    %cst_6 = arith.constant dense<0.000000e+00> : vector<256xf32>
    %12 = vector.multi_reduction <add>, %11, %cst_6 [0] : vector<4x256xf32> to vector<256xf32>
    %13 = vector.shape_cast %12 : vector<256xf32> to vector<1x256xf32>
    %14 = math.log %13 : vector<1x256xf32>
    %15 = vector.broadcast %14 : vector<1x256xf32> to vector<4x256xf32>
    %16 = arith.subf %10, %15 : vector<4x256xf32>
    %17 = tpu.iota {dimensions = array<i32: 0>} : vector<4x1xi32>
    %18 = vector.broadcast %17 : vector<4x1xi32> to vector<4x256xi32>
    %19 = vector.broadcast %6 : vector<1x256xi32> to vector<4x256xi32>
    %20 = arith.cmpi eq, %18, %19 : vector<4x256xi32>
    %cst_7 = arith.constant 1.000000e+00 : f32
    %cst_8 = arith.constant 0.000000e+00 : f32
    %21 = vector.broadcast %cst_7 : f32 to vector<4x256xf32>
    %22 = vector.broadcast %cst_8 : f32 to vector<4x256xf32>
    %23 = arith.select %20, %21, %22 : vector<4x256xi1>, vector<4x256xf32>
    %cst_9 = arith.constant dense<0.000000e+00> : vector<4xf32>
    %24 = vector.multi_reduction <add>, %23, %cst_9 [1] : vector<4x256xf32> to vector<4xf32>
    %25 = vector.shape_cast %24 : vector<4xf32> to vector<4x1xf32>
    %cst_10 = arith.constant 0.000000e+00 : f32
    %26 = vector.broadcast %cst_10 : f32 to vector<4x256xf32>
    %27 = arith.select %20, %16, %26 : vector<4x256xi1>, vector<4x256xf32>
    %cst_11 = arith.constant dense<0.000000e+00> : vector<4xf32>
    %28 = vector.multi_reduction <add>, %27, %cst_11 [1] : vector<4x256xf32> to vector<4xf32>
    %29 = vector.shape_cast %28 : vector<4xf32> to vector<4x1xf32>
    %c0_12 = arith.constant 0 : index
    %c0_13 = arith.constant 0 : index
    %c0_14 = arith.constant 0 : index
    %c0_15 = arith.constant 0 : index
    %30 = vector.load %arg5[%c0_12, %c0_13, %c0_14, %c0_15] : memref<1x1x4x1xf32, #tpu.memory_space<vmem>>, vector<1x1x4x1xf32>
    %31 = vector.shape_cast %25 : vector<4x1xf32> to vector<1x1x4x1xf32>
    %32 = arith.addf %30, %31 : vector<1x1x4x1xf32>
    %c0_16 = arith.constant 0 : index
    %c0_17 = arith.constant 0 : index
    %c0_18 = arith.constant 0 : index
    %c0_19 = arith.constant 0 : index
    %33 = vector.load %arg5[%c0_16, %c0_17, %c0_18, %c0_19] : memref<1x1x4x1xf32, #tpu.memory_space<vmem>>, vector<1x1x4x1xf32>
    tpu.vector_store %arg5[%c0_16, %c0_17, %c0_18, %c0_19], %32 {strides = array<i32>} : memref<1x1x4x1xf32, #tpu.memory_space<vmem>>, vector<1x1x4x1xf32>,
    %c0_20 = arith.constant 0 : index
    %c0_21 = arith.constant 0 : index
    %c0_22 = arith.constant 0 : index
    %c0_23 = arith.constant 0 : index
    %34 = vector.load %arg6[%c0_20, %c0_21, %c0_22, %c0_23] : memref<1x1x4x1xf32, #tpu.memory_space<vmem>>, vector<1x1x4x1xf32>
    %35 = vector.shape_cast %29 : vector<4x1xf32> to vector<1x1x4x1xf32>
    %36 = arith.addf %34, %35 : vector<1x1x4x1xf32>
    %c0_24 = arith.constant 0 : index
    %c0_25 = arith.constant 0 : index
    %c0_26 = arith.constant 0 : index
    %c0_27 = arith.constant 0 : index
    %37 = vector.load %arg6[%c0_24, %c0_25, %c0_26, %c0_27] : memref<1x1x4x1xf32, #tpu.memory_space<vmem>>, vector<1x1x4x1xf32>
    tpu.vector_store %arg6[%c0_24, %c0_25, %c0_26, %c0_27], %36 {strides = array<i32>} : memref<1x1x4x1xf32, #tpu.memory_space<vmem>>, vector<1x1x4x1xf32>,
    return
  }
  func.func @transform_0(%arg0: i32, %arg1: i32, %arg2: i32) -> (i32, i32, i32) {
    %c1_i32 = arith.constant 1 : i32
    %0 = arith.muli %arg1, %c1_i32 : i32
    %1 = arith.addi %0, %arg2 : i32
    %c0_i32 = arith.constant 0 : i32
    %c0_i32_0 = arith.constant 0 : i32
    return %arg0, %c0_i32, %1 : i32, i32, i32
  }
  func.func @transform_1(%arg0: i32, %arg1: i32, %arg2: i32) -> (i32, i32, i32) {
    %c1_i32 = arith.constant 1 : i32
    %0 = arith.muli %arg1, %c1_i32 : i32
    %1 = arith.addi %0, %arg2 : i32
    %c0_i32 = arith.constant 0 : i32
    %c0_i32_0 = arith.constant 0 : i32
    return %arg0, %c0_i32, %1 : i32, i32, i32
  }
  func.func @transform_2(%arg0: i32, %arg1: i32, %arg2: i32) -> (i32, i32, i32, i32) {
    %c0_i32 = arith.constant 0 : i32
    %c0_i32_0 = arith.constant 0 : i32
    %c0_i32_1 = arith.constant 0 : i32
    return %arg0, %arg1, %c0_i32, %c0_i32_0 : i32, i32, i32, i32
  }
  func.func @transform_3(%arg0: i32, %arg1: i32, %arg2: i32) -> (i32, i32, i32, i32) {
    %c0_i32 = arith.constant 0 : i32
    %c0_i32_0 = arith.constant 0 : i32
    %c0_i32_1 = arith.constant 0 : i32
    return %arg0, %arg1, %c0_i32, %c0_i32_0 : i32, i32, i32, i32
  }
}

</mosaic_0001>

<bundles_post_ra>
// kernel: _loss_impl.1
= control target key start
LH: loop header
LB: loop body
LE: loop exit
PB: predicated region body
PF: predicated region fallthrough
CT: control target
= control target key end

     0   :  { %s600_s12 = smov 0   ;;  %s602_s13 = smov 0   ;;  %s684_s0 = inlined_call_operand.vmem [shape: f32[2,4,256], index: 0, kind: input, shape index: {}]   ;;  %s685_s1 = inlined_call_operand.vmem [shape: s32[2,1,256], index: 1, kind: input, shape index: {}]   ;;  %s686_s2 = inlined_call_operand.vmem [shape: f32[2,1,4,1], index: 2, kind: output, shape index: {0}]   ;;  %s687_s3 = inlined_call_operand.vmem [shape: f32[2,1,4,1], index: 3, kind: output, shape index: {1}]  }
   0x1   :  { %s604_s14 = smov 0  }
   0x2 LB: > { %s33_s15 = sadd.s32 1, %s573_s13  ;;  %p514_p0 = scmp.ge.s32.totalorder %s577_s14, 1  ;;  %s577_s14 = sphi %s604_s14, %s14_s14   ;;  %s573_s13 = sphi %s602_s13, %s689_s13   ;;  %s569_s12 = sphi %s600_s12, %s688_s12  }
   0x3   : > { %p35_p1 = scmp.ge.s32.totalorder %s33_s15, 2  ;;  %p194_p2 = scmp.lt.s32.totalorder %s577_s14, 3 }
   0x5   : > { %s691_s15 = smov (%p35_p1, %s33_s15), 0  ;;  %p195_p3 = pnand %p514_p0, %p194_p2 }
   0x6   : > { %p243_p4 = scmp.lt.s32.totalorder (!%p195_p3), %s569_s12, 1 }
   0x7   : > { %198 = sbr.rel (%p195_p3) target bundleno = 234 (0xea), region = 28 }
   0xc   : > { %v338_v0 = vlaneseq  ;;  %s693_s12 = smov (!%p243_p4, %s569_s12), 1  ;;  %vm290_vm0 = vcmask 1043456   ;;  %vm282_vm1 = vcmask 3072   ;;  %v579_v11 = vmov 0.0  }
   0xd   : > { %s517_s16 = sshll.u32 %s693_s12, 1  ;;  %s522_s17 = sshll.u32 %s693_s12, 3 }
   0xe   : > { %v620_v1 = vshrl.u32 %v338_v0, 7  ;;  %s261_s20 = scalar_lea.vmem %s685_s1, %s517_s16  ;;  %s250_s23 = scalar_lea.vmem %s684_s0, %s522_s17 }
   0xf   : > { %v286_v4 = vld [vmem:[%s261_s20] sm:$0x3]  ;;  %s518_s24 = sshll.u32 %s693_s12, 2 }
  0x10   : > { %v342_v2 = vsub.s32 0, %v620_v1  ;;  %v346_v3 = vsub.s32 1, %v620_v1  ;;  %v285_v5 = vld [vmem:[%s250_s23] sm:$0xff]  ;;  %s639_s27 = scalar_lea.vmem %s686_s2, %s518_s24  ;;  %s657_s30 = scalar_lea.vmem %s687_s3, %s518_s24 }
  0x11   : > { %v288_v8 = vcombine.high %v285_v5, %v285_v5  ;;  %v291_v9 = vsel %vm290_vm0, %v285_v5, -inf  ;;  %283 = vst.msk [vmem:[%s639_s27] sm:$0xf] %vm282_vm1, %v579_v11  ;;  %284 = vst.msk [vmem:[%s657_s30] sm:$0xf] %vm282_vm1, %v579_v11 }
  0x12   : > { %v343_v6 = vrot.slane %v286_v4, %v342_v2  ;;  %v347_v7 = vrot.slane %v286_v4, %v346_v3  ;;  %v292_v10 = vrot.slane %v291_v9, 4 }
  0x13   : > { %v298_v12 = vsel %vm290_vm0, %v288_v8, -inf }
  0x14   : > { %vm348_vm2 = vcmp.eq.s32.totalorder %v620_v1, %v343_v6  ;;  %vm349_vm3 = vcmp.eq.s32.totalorder %v620_v1, %v347_v7  ;;  %v293_v15 = vmax.f32 %v291_v9, %v292_v10  ;;  %v299_v16 = vrot.slane %v298_v12, 4 }
  0x15   : > { %v350_v13 = vsel %vm348_vm2, 1.0, %v579_v11  ;;  %v351_v14 = vsel %vm349_vm3, 1.0, %v579_v11 }
  0x16   : > { %v352_v17 = vsel %vm290_vm0, %v350_v13, 0.0  ;;  %v353_v18 = vsel %vm290_vm0, %v351_v14, 0.0  ;;  %v294_v20 = vrot.slane %v293_v15, 2  ;;  %v300_v21 = vmax.f32 %v298_v12, %v299_v16 }
  0x17   : > { %v354_v19 = vadd.f32 %v353_v18, %v352_v17 }
  0x18   : > { %v295_v22 = vmax.f32 %v293_v15, %v294_v20  ;;  %v301_v23 = vrot.slane %v300_v21, 2  ;;  %v367_v60 = vld [vmem:[%s639_s27] sm:$0xf] }
  0x19   : > { %355 = vadd.xlane.f32.xlu0 %v354_v19  ;;  %v371_v63 = vld [vmem:[%s657_s30] sm:$0xf] }
  0x1a   : > { %v296_v24 = vrot.slane %v295_v22, 1  ;;  %v302_v25 = vmax.f32 %v300_v21, %v301_v23 }
  0x1c   : > { %v297_v26 = vmax.f32 %v295_v22, %v296_v24  ;;  %v303_v27 = vrot.slane %v302_v25, 1 }
  0x1e   : > { %v304_v28 = vmax.f32 %v302_v25, %v303_v27 }
  0x20   : > { %v307_v29 = vcombine.low %v297_v26, %v304_v28 }
  0x22   : > { %v309_v30 = vsub.f32 %v285_v5, %v307_v29 }
  0x24   : > { %v310_v31 = vmul.f32 1.442695, %v309_v30 }
  0x26   : > { %549 = vpow2.f32 %v310_v31 }
  0x33   : > { %v550_v32 = vpop.eup %549 }
  0x34   : > { %v313_v33 = vcombine.high %v550_v32, %v550_v32  ;;  %v315_v34 = vsel %vm290_vm0, %v550_v32, 0.0 }
  0x35   : > { %v316_v35 = vrot.slane %v315_v34, 4 }
  0x36   : > { %v322_v36 = vsel %vm290_vm0, %v313_v33, 0.0 }
  0x37   : > { %v317_v37 = vadd.f32 %v316_v35, %v315_v34  ;;  %v323_v38 = vrot.slane %v322_v36, 4 }
  0x39   : > { %v318_v39 = vrot.slane %v317_v37, 2  ;;  %v324_v40 = vadd.f32 %v323_v38, %v322_v36 }
  0x3b   : > { %v319_v41 = vadd.f32 %v318_v39, %v317_v37  ;;  %v325_v42 = vrot.slane %v324_v40, 2 }
  0x3d   : > { %v320_v43 = vrot.slane %v319_v41, 1  ;;  %v326_v44 = vadd.f32 %v325_v42, %v324_v40 }
  0x3f   : > { %v321_v45 = vadd.f32 %v320_v43, %v319_v41  ;;  %v327_v46 = vrot.slane %v326_v44, 1 }
  0x41   : > { %v328_v47 = vadd.f32 %v327_v46, %v326_v44  ;;  %551 = vlog2.f32 %v321_v45 }
  0x43   : > { %553 = vlog2.f32 %v328_v47 }
  0x4e   : > { %v552_v48 = vpop.eup %551 }
  0x4f   : > { %v330_v49 = vmul.f32 0.6931472, %v552_v48 }
  0x50   : > { %v554_v50 = vpop.eup %553 }
  0x51   : > { %v332_v51 = vmul.f32 0.6931472, %v554_v50 }
  0x53   : > { %v335_v52 = vcombine.low %v330_v49, %v332_v51 }
  0x55   : > { %v337_v53 = vsub.f32 %v309_v30, %v335_v52 }
  0x57   : > { %v358_v54 = vcombine.high %v337_v53, %v337_v53  ;;  %v360_v55 = vsel %vm348_vm2, %v337_v53, 0.0 }
  0x58   : > { %v362_v56 = vsel %vm290_vm0, %v360_v55, 0.0 }
  0x59   : > { %v361_v57 = vsel %vm349_vm3, %v358_v54, 0.0 }
  0x5a   : > { %v363_v58 = vsel %vm290_vm0, %v361_v57, 0.0 }
  0x5b   : > { %v364_v59 = vadd.f32 %v363_v58, %v362_v56 }
  0x5d   : > { %365 = vadd.xlane.f32.xlu0 %v364_v59 }
  0xa2   : > { %v356_v61 = vpop.xlane.xlu0 %355 }
  0xa3   : > { %v368_v62 = vadd.f32 %v367_v60, %v356_v61 }
  0xa5   : > { %370 = vst.msk [vmem:[%s639_s27] sm:$0xf] %vm282_vm1, %v368_v62 }
  0xe6   : > { %v366_v0 = vpop.xlane.xlu0 %365 }
  0xe7   : > { %v372_v2 = vadd.f32 %v371_v63, %v366_v0 }
  0xe9   : > { %373 = vst.msk [vmem:[%s657_s30] sm:$0xf] %vm282_vm1, %v372_v2 }
  0xea PF: > { %s14_s14 = sadd.s32 1, %s577_s14   ;;  %s688_s12 = smov %s573_s13 }
  0xeb   : > { %p11_p5 = scmp.ge.s32.totalorder %s14_s14, 4   ;;  %s689_s13 = smov %s691_s15 }
  0xed   :  { %13 = sbr.rel (!%p11_p5) target bundleno = 2 (0x2), region = 77 }

</bundles_post_ra>
